<compile_context>
chip_gen: v7x
topology: tpu7x:2x2x1
jax: 0.10.0
libtpu: 0.0.40
codegen_flags: <defaults>
</compile_context>

<pallas_src>
import jax
import jax.numpy as jnp
from jax.experimental import pallas as pl
from jax.experimental.pallas import tpu as pltpu

N_STATES = 6
N_ACTIONS = 25
HIDDEN = 128


def _round_up(n, m):
    return ((n + m - 1) // m) * m


def net_kernel(x_ref, w1_ref, b1_ref, w2_ref, b2_ref, o_ref):
    # fc1 + folded bias: K=6 is far too small for the MXU, so compute it on the
    # VPU as 6 statically-unrolled broadcast multiply-adds over the [tb, 128]
    # hidden tile (exact f32, no K padding needed).
    x = x_ref[...]                                    # [tb, 6]   f32
    w1 = w1_ref[...]                                  # [6, 128]  f32
    h = b1_ref[...] + x[:, 0:1] * w1[0:1, :]          # bias folded into init
    for k in range(1, N_STATES):                      # static unroll (5 terms)
        h = h + x[:, k:k + 1] * w1[k:k + 1, :]
    h = jnp.maximum(h, 0.0)                           # ReLU in f32

    # fc2 on the MXU: [tb, 128] @ [128, 25], f32 accumulation.  The narrow
    # N=25 result is stored directly (masked vst) — the vector-store slot has
    # huge slack here and this keeps HBM writeback at 25 f32 per row.
    out = jnp.dot(h, w2_ref[...], preferred_element_type=jnp.float32)
    o_ref[...] = (out + b2_ref[...]).astype(o_ref.dtype)


def prepare_params(w1, b1, w2, b2):
    """One-time parameter prep (call when params change, NOT per forward call).
    w1: [N_STATES, HIDDEN], w2: [HIDDEN, N_ACTIONS] (pre-transposed vs PyTorch),
    biases reshaped to [1, F] rows; everything f32, nothing padded."""
    return (jnp.asarray(w1, jnp.float32),
            jnp.reshape(jnp.asarray(b1, jnp.float32), (1, HIDDEN)),
            jnp.asarray(w2, jnp.float32),
            jnp.reshape(jnp.asarray(b2, jnp.float32), (1, N_ACTIONS)))


def net_forward(x, params, *, block_b=2048):
    """x: [B, N_STATES] f32; params: output of prepare_params().
    Returns [B, N_ACTIONS] f32 Q-values."""
    w1, b1, w2, b2 = params
    x = jnp.asarray(x, jnp.float32)
    B = x.shape[0]

    # Batch tile: multiple of 8 (f32 sublane), capped at block_b, and chosen so
    # the grid has >=2 steps whenever B allows it (v7x dual-TensorCore sharding
    # via the "parallel" batch axis).
    tb = min(block_b, max(8, _round_up(pl.cdiv(B, 2), 8)))
    b_pad = _round_up(B, tb)
    xp = x if b_pad == B else jnp.pad(x, ((0, b_pad - B), (0, 0)))

    cost = pl.CostEstimate(
        flops=2 * b_pad * (N_STATES * HIDDEN + HIDDEN * N_ACTIONS),
        transcendentals=0,
        bytes_accessed=(b_pad * N_STATES * 4          # x
                        + N_STATES * HIDDEN * 4       # w1
                        + HIDDEN * 4                  # b1
                        + HIDDEN * N_ACTIONS * 4      # w2
                        + N_ACTIONS * 4               # b2
                        + b_pad * N_ACTIONS * 4),     # out (narrow!)
    )

    out = pl.pallas_call(
        net_kernel,
        out_shape=jax.ShapeDtypeStruct((b_pad, N_ACTIONS), jnp.float32),
        grid=(b_pad // tb,),
        in_specs=[
            pl.BlockSpec((tb, N_STATES), lambda i: (i, 0)),       # x tile (pipelined)
            pl.BlockSpec((N_STATES, HIDDEN), lambda i: (0, 0)),   # w1 (resident)
            pl.BlockSpec((1, HIDDEN), lambda i: (0, 0)),          # b1 (resident)
            pl.BlockSpec((HIDDEN, N_ACTIONS), lambda i: (0, 0)),  # w2 (resident)
            pl.BlockSpec((1, N_ACTIONS), lambda i: (0, 0)),       # b2 (resident)
        ],
        out_specs=pl.BlockSpec((tb, N_ACTIONS), lambda i: (i, 0)),
        compiler_params=pltpu.CompilerParams(
            dimension_semantics=("parallel",),
            vmem_limit_bytes=32 * 1024 * 1024),
        cost_estimate=cost,
    )(xp, w1, b1, w2, b2)

    # Only the batch padding (if any) needs stripping; features are already 25.
    return out if b_pad == B else out[:B]


def init_params(key):
    """Synthetic init matching the PyTorch module: weights ~ Normal(0, 0.1),
    biases use nn.Linear's default Uniform(-1/sqrt(fan_in), 1/sqrt(fan_in))."""
    k1, k2, k3, k4 = jax.random.split(key, 4)
    w1 = 0.1 * jax.random.normal(k1, (N_STATES, HIDDEN), dtype=jnp.float32)
    bound1 = 1.0 / jnp.sqrt(jnp.float32(N_STATES))
    b1 = jax.random.uniform(k2, (HIDDEN,), minval=-bound1, maxval=bound1,
                            dtype=jnp.float32)
    w2 = 0.1 * jax.random.normal(k3, (HIDDEN, N_ACTIONS), dtype=jnp.float32)
    bound2 = 1.0 / jnp.sqrt(jnp.float32(HIDDEN))
    b2 = jax.random.uniform(k4, (N_ACTIONS,), minval=-bound2, maxval=bound2,
                            dtype=jnp.float32)
    return w1, b1, w2, b2


def reference_forward_f32(x, w1, b1, w2, b2):
    h = jnp.maximum(x @ w1 + b1.reshape(1, -1), 0.0)
    return h @ w2 + b2.reshape(1, -1)


if __name__ == "__main__":
    key = jax.random.PRNGKey(0)
    kx, kx2, kp = jax.random.split(key, 3)

    w1, b1, w2, b2 = init_params(kp)
    params = prepare_params(w1, b1, w2, b2)

    # Small batch (DQN-style action selection).
    B = 2
    x = jax.random.normal(kx, (B, N_STATES), dtype=jnp.float32)
    out = jax.block_until_ready(net_forward(x, params))
    assert out.shape == (B, N_ACTIONS)
    ref = reference_forward_f32(x, w1, b1, w2, b2)
    assert jnp.allclose(out, ref, atol=1e-2, rtol=1e-2)

    # Larger, non-tile-aligned batch: exercises batch padding and a >=2-step grid.
    B2 = 300
    x2 = jax.random.normal(kx2, (B2, N_STATES), dtype=jnp.float32)
    out2 = jax.block_until_ready(net_forward(x2, params))
    assert out2.shape == (B2, N_ACTIONS)
    ref2 = reference_forward_f32(x2, w1, b1, w2, b2)
    assert jnp.allclose(out2, ref2, atol=1e-2, rtol=1e-2)

    print("KERNEL_OK")
</pallas_src>

<mosaic_0001>
module attributes {stable_mosaic.version = 11 : i64} {
  func.func @net_kernel(%arg0: i32, %arg1: memref<8x6xf32, #tpu.memory_space<vmem>>, %arg2: memref<6x128xf32, #tpu.memory_space<vmem>>, %arg3: memref<1x128xf32, #tpu.memory_space<vmem>>, %arg4: memref<128x25xf32, #tpu.memory_space<vmem>>, %arg5: memref<1x25xf32, #tpu.memory_space<vmem>>, %arg6: memref<8x25xf32, #tpu.memory_space<vmem>>) attributes {dimension_semantics = [#tpu.dimension_semantics<parallel>], iteration_bounds = array<i64: 1>, scalar_prefetch = 0 : i64, scratch_operands = 0 : i64, tpu.core_type = #tpu.core_type<tc>, window_params = [{transform_indices = @transform_0, window_bounds = array<i64: 8, 6>}, {pipeline_mode = #tpu.pipeline_mode<synchronous>, transform_indices = @transform_1, window_bounds = array<i64: 6, 128>}, {pipeline_mode = #tpu.pipeline_mode<synchronous>, transform_indices = @transform_2, window_bounds = array<i64: 1, 128>}, {pipeline_mode = #tpu.pipeline_mode<synchronous>, transform_indices = @transform_3, window_bounds = array<i64: 128, 25>}, {pipeline_mode = #tpu.pipeline_mode<synchronous>, transform_indices = @transform_4, window_bounds = array<i64: 1, 25>}, {transform_indices = @transform_5, window_bounds = array<i64: 8, 25>}]} {
    %c0 = arith.constant 0 : index
    %c0_0 = arith.constant 0 : index
    %0 = vector.load %arg1[%c0, %c0_0] : memref<8x6xf32, #tpu.memory_space<vmem>>, vector<8x6xf32>
    %c0_1 = arith.constant 0 : index
    %c0_2 = arith.constant 0 : index
    %1 = vector.load %arg2[%c0_1, %c0_2] : memref<6x128xf32, #tpu.memory_space<vmem>>, vector<6x128xf32>
    %c0_3 = arith.constant 0 : index
    %c0_4 = arith.constant 0 : index
    %2 = vector.load %arg3[%c0_3, %c0_4] : memref<1x128xf32, #tpu.memory_space<vmem>>, vector<1x128xf32>
    %3 = vector.extract_strided_slice %0 {offsets = [0, 0], sizes = [8, 1], strides = [1, 1]} : vector<8x6xf32> to vector<8x1xf32>
    %4 = vector.extract_strided_slice %1 {offsets = [0, 0], sizes = [1, 128], strides = [1, 1]} : vector<6x128xf32> to vector<1x128xf32>
    %5 = vector.broadcast %3 : vector<8x1xf32> to vector<8x128xf32>
    %6 = vector.broadcast %4 : vector<1x128xf32> to vector<8x128xf32>
    %7 = arith.mulf %5, %6 : vector<8x128xf32>
    %8 = vector.broadcast %2 : vector<1x128xf32> to vector<8x128xf32>
    %9 = arith.addf %8, %7 : vector<8x128xf32>
    %10 = vector.extract_strided_slice %0 {offsets = [0, 1], sizes = [8, 1], strides = [1, 1]} : vector<8x6xf32> to vector<8x1xf32>
    %11 = vector.extract_strided_slice %1 {offsets = [1, 0], sizes = [1, 128], strides = [1, 1]} : vector<6x128xf32> to vector<1x128xf32>
    %12 = vector.broadcast %10 : vector<8x1xf32> to vector<8x128xf32>
    %13 = vector.broadcast %11 : vector<1x128xf32> to vector<8x128xf32>
    %14 = arith.mulf %12, %13 : vector<8x128xf32>
    %15 = arith.addf %9, %14 : vector<8x128xf32>
    %16 = vector.extract_strided_slice %0 {offsets = [0, 2], sizes = [8, 1], strides = [1, 1]} : vector<8x6xf32> to vector<8x1xf32>
    %17 = vector.extract_strided_slice %1 {offsets = [2, 0], sizes = [1, 128], strides = [1, 1]} : vector<6x128xf32> to vector<1x128xf32>
    %18 = vector.broadcast %16 : vector<8x1xf32> to vector<8x128xf32>
    %19 = vector.broadcast %17 : vector<1x128xf32> to vector<8x128xf32>
    %20 = arith.mulf %18, %19 : vector<8x128xf32>
    %21 = arith.addf %15, %20 : vector<8x128xf32>
    %22 = vector.extract_strided_slice %0 {offsets = [0, 3], sizes = [8, 1], strides = [1, 1]} : vector<8x6xf32> to vector<8x1xf32>
    %23 = vector.extract_strided_slice %1 {offsets = [3, 0], sizes = [1, 128], strides = [1, 1]} : vector<6x128xf32> to vector<1x128xf32>
    %24 = vector.broadcast %22 : vector<8x1xf32> to vector<8x128xf32>
    %25 = vector.broadcast %23 : vector<1x128xf32> to vector<8x128xf32>
    %26 = arith.mulf %24, %25 : vector<8x128xf32>
    %27 = arith.addf %21, %26 : vector<8x128xf32>
    %28 = vector.extract_strided_slice %0 {offsets = [0, 4], sizes = [8, 1], strides = [1, 1]} : vector<8x6xf32> to vector<8x1xf32>
    %29 = vector.extract_strided_slice %1 {offsets = [4, 0], sizes = [1, 128], strides = [1, 1]} : vector<6x128xf32> to vector<1x128xf32>
    %30 = vector.broadcast %28 : vector<8x1xf32> to vector<8x128xf32>
    %31 = vector.broadcast %29 : vector<1x128xf32> to vector<8x128xf32>
    %32 = arith.mulf %30, %31 : vector<8x128xf32>
    %33 = arith.addf %27, %32 : vector<8x128xf32>
    %34 = vector.extract_strided_slice %0 {offsets = [0, 5], sizes = [8, 1], strides = [1, 1]} : vector<8x6xf32> to vector<8x1xf32>
    %35 = vector.extract_strided_slice %1 {offsets = [5, 0], sizes = [1, 128], strides = [1, 1]} : vector<6x128xf32> to vector<1x128xf32>
    %36 = vector.broadcast %34 : vector<8x1xf32> to vector<8x128xf32>
    %37 = vector.broadcast %35 : vector<1x128xf32> to vector<8x128xf32>
    %38 = arith.mulf %36, %37 : vector<8x128xf32>
    %39 = arith.addf %33, %38 : vector<8x128xf32>
    %cst = arith.constant 0.000000e+00 : f32
    %40 = vector.broadcast %cst : f32 to vector<8x128xf32>
    %41 = arith.maximumf %39, %40 : vector<8x128xf32>
    %c0_5 = arith.constant 0 : index
    %c0_6 = arith.constant 0 : index
    %42 = vector.load %arg4[%c0_5, %c0_6] : memref<128x25xf32, #tpu.memory_space<vmem>>, vector<128x25xf32>
    %cst_7 = arith.constant dense<0.000000e+00> : vector<8x25xf32>
    %43 = tpu.matmul %41, %42, %cst_7 {dimension_numbers = #tpu.dot_dimension_numbers<[1], [0], [0], [1], [0, 0, 1, 1], [], []>} : vector<8x128xf32>, vector<128x25xf32>, vector<8x25xf32> -> vector<8x25xf32>
    %c0_8 = arith.constant 0 : index
    %c0_9 = arith.constant 0 : index
    %44 = vector.load %arg5[%c0_8, %c0_9] : memref<1x25xf32, #tpu.memory_space<vmem>>, vector<1x25xf32>
    %45 = vector.broadcast %44 : vector<1x25xf32> to vector<8x25xf32>
    %46 = arith.addf %43, %45 : vector<8x25xf32>
    %c0_10 = arith.constant 0 : index
    %c0_11 = arith.constant 0 : index
    %47 = vector.load %arg6[%c0_10, %c0_11] : memref<8x25xf32, #tpu.memory_space<vmem>>, vector<8x25xf32>
    tpu.vector_store %arg6[%c0_10, %c0_11], %46 {strides = array<i32>} : memref<8x25xf32, #tpu.memory_space<vmem>>, vector<8x25xf32>,
    return
  }
  func.func @transform_0(%arg0: i32) -> (i32, i32) {
    %c0_i32 = arith.constant 0 : i32
    %c0_i32_0 = arith.constant 0 : i32
    return %arg0, %c0_i32 : i32, i32
  }
  func.func @transform_1(%arg0: i32) -> (i32, i32) {
    %c0_i32 = arith.constant 0 : i32
    %c0_i32_0 = arith.constant 0 : i32
    %c0_i32_1 = arith.constant 0 : i32
    return %c0_i32, %c0_i32_0 : i32, i32
  }
  func.func @transform_2(%arg0: i32) -> (i32, i32) {
    %c0_i32 = arith.constant 0 : i32
    %c0_i32_0 = arith.constant 0 : i32
    %c0_i32_1 = arith.constant 0 : i32
    return %c0_i32, %c0_i32_0 : i32, i32
  }
  func.func @transform_3(%arg0: i32) -> (i32, i32) {
    %c0_i32 = arith.constant 0 : i32
    %c0_i32_0 = arith.constant 0 : i32
    %c0_i32_1 = arith.constant 0 : i32
    return %c0_i32, %c0_i32_0 : i32, i32
  }
  func.func @transform_4(%arg0: i32) -> (i32, i32) {
    %c0_i32 = arith.constant 0 : i32
    %c0_i32_0 = arith.constant 0 : i32
    %c0_i32_1 = arith.constant 0 : i32
    return %c0_i32, %c0_i32_0 : i32, i32
  }
  func.func @transform_5(%arg0: i32) -> (i32, i32) {
    %c0_i32 = arith.constant 0 : i32
    %c0_i32_0 = arith.constant 0 : i32
    return %arg0, %c0_i32 : i32, i32
  }
}

</mosaic_0001>

<bundles_post_ra>
// kernel: tpu_custom_call.1
= control target key start
LH: loop header
LB: loop body
LE: loop exit
PB: predicated region body
PF: predicated region fallthrough
CT: control target
= control target key end

     0   :  { %v319_v2 = vmov 0   ;;  %v320_v3 = vmov 2   ;;  %v321_v8 = vmov 0.0|0.0   ;;  %s431_s0 = inlined_call_operand.vmem [shape: f32[8,6], index: 0, kind: input, shape index: {}]   ;;  %s432_s1 = inlined_call_operand.vmem [shape: f32[6,128], index: 1, kind: input, shape index: {}]   ;;  %s433_s2 = inlined_call_operand.vmem [shape: f32[1,128], index: 2, kind: input, shape index: {}]   ;;  %s434_s3 = inlined_call_operand.vmem [shape: f32[128,25], index: 3, kind: input, shape index: {}]   ;;  %s435_s4 = inlined_call_operand.vmem [shape: f32[1,25], index: 4, kind: input, shape index: {}]   ;;  %s436_s5 = inlined_call_operand.hbm [shape: f32[8,25], index: 5, kind: output, shape index: {}]  }
   0x1   :  { %v21_v0 = vld [vmem:[%s431_s0] sm:$0xff]  ;;  %289 = vset.pattern.permute.xlu0 %v319_v2  ;;  %291 = vset.pattern.permute.xlu1 %v320_v3  ;;  %v93_v4 = vld [vmem:[%s434_s3 + $0x8] sm:$0xff]  ;;  %v94_v5 = vld [vmem:[%s434_s3 + $0x10] sm:$0xff] }
   0x2   :  { %v92_v1 = vld [vmem:[%s434_s3] sm:$0xff]  ;;  %v95_v6 = vld [vmem:[%s434_s3 + $0x18] sm:$0xff]  ;;  %26 = vperm.xlu0 %289, %v21_v0   ;;  %52 = vperm.xlu1 %291, %v21_v0  }
   0x3   :  { %v256_v7 = vpack.c.bf16 %v93_v4, %v92_v1  ;;  %255 = vmatprep.subr.bf16.mxu0 %v321_v8  ;;  %v259_v9 = vpack.c.bf16 %v95_v6, %v94_v5 }
   0x5   :  { %257 = vmatpush3.bf16.msra.mxu0 %v256_v7 }
   0x6   :  { %10 = vsyncpa [#allocation3], 0  ;;  %258 = vmatprep.subr.bf16.mxu0 %v321_v8  ;;  %v322_v10 = vmov 1   ;;  %v323_v11 = vmov 3   ;;  %v96_v12 = vld [vmem:[%s434_s3 + $0x20] sm:$0xff]  ;;  %v97_v13 = vld [vmem:[%s434_s3 + $0x28] sm:$0xff]  ;;  %v29_v33 = vlaneseq }
   0x7   :  { %290 = vset.pattern.permute.xlu0 %v322_v10  ;;  %292 = vset.pattern.permute.xlu1 %v323_v11  ;;  %v262_v14 = vpack.c.bf16 %v97_v13, %v96_v12  ;;  %v98_v15 = vld [vmem:[%s434_s3 + $0x30] sm:$0xff]  ;;  %v99_v16 = vld [vmem:[%s434_s3 + $0x38] sm:$0xff]  ;;  %v324_v17 = vmov 4   ;;  %v325_v18 = vmov 5   ;;  %v100_v20 = vld [vmem:[%s434_s3 + $0x40] sm:$0xff]  ;;  %vm326_vm0 = vmmov 0  }
   0x8   :  { %42 = vperm.xlu0 %290, %v21_v0   ;;  %62 = vperm.xlu1 %292, %v21_v0   ;;  %v265_v19 = vpack.c.bf16 %v99_v16, %v98_v15  ;;  %v101_v21 = vld [vmem:[%s434_s3 + $0x48] sm:$0xff]  ;;  %v102_v23 = vld [vmem:[%s434_s3 + $0x50] sm:$0xff]  ;;  %v103_v24 = vld [vmem:[%s434_s3 + $0x58] sm:$0xff]  ;;  %v327_v25 = vmov 0.0   ;;  %v30_v34 = vshrl.u32 %v29_v33, 7  ;;  %s328_s28 = smov [#allocation2]  }
   0x9   :  { %260 = vmatpush3.bf16.msra.mxu0 %v259_v9  ;;  %v268_v22 = vpack.c.bf16 %v101_v21, %v100_v20  ;;  %252 = vmatprep.mubr.msk.f32.mxu0 %vm326_vm0, %v327_v25  ;;  %v271_v26 = vpack.c.bf16 %v103_v24, %v102_v23  ;;  %v104_v27 = vld [vmem:[%s434_s3 + $0x60] sm:$0xff]  ;;  %v105_v28 = vld [vmem:[%s434_s3 + $0x68] sm:$0xff]  ;;  %v106_v30 = vld [vmem:[%s434_s3 + $0x70] sm:$0xff]  ;;  %s193_s29 = sshll.u32 %s328_s28, 4  ;;  %vm185_vm1 = vcmask 203776   ;;  %s194_s29 = int_to_ptr.vmem [resolvable:$true] %s193_s29 }
   0xa   :  { %261 = vmatprep.subr.bf16.mxu0 %v321_v8  ;;  %v274_v29 = vpack.c.bf16 %v105_v28, %v104_v27  ;;  %v107_v31 = vld [vmem:[%s434_s3 + $0x78] sm:$0xff]  ;;  %v31_v35 = vsub.s32 0, %v30_v34  ;;  %v22_v36 = vld [vmem:[%s432_s1] sm:$0x3f]  ;;  %v47_v38 = vsub.s32 1, %v30_v34  ;;  %v57_v40 = vsub.s32 2, %v30_v34  ;;  %p300_p1 = scmp.lt.s32.totalorder %s194_s29, %s194_s29 }
   0xb   :  { %v277_v32 = vpack.c.bf16 %v107_v31, %v106_v30  ;;  %v67_v44 = vsub.s32 3, %v30_v34  ;;  %v201_v45 = vld [vmem:[%s433_s2] ss:$0 sm:$0xff]  ;;  %v77_v46 = vsub.s32 4, %v30_v34  ;;  %v87_v48 = vsub.s32 5, %v30_v34  ;;  %s295_s30 = scalar_lea.vmem %s194_s29, 128 }
   0xc   :  { %293 = vset.pattern.permute.xlu1 %v324_v17  ;;  %294 = vset.pattern.permute.xlu0 %v325_v18  ;;  %v32_v37 = vrot.slane %v22_v36, %v31_v35  ;;  %v48_v43 = vrot.slane %v22_v36, %v47_v38  ;;  %v58_v47 = vrot.slane %v22_v36, %v57_v40  ;;  %v202_v4 = vld [vmem:[%s435_s4] ss:$0 sm:$0xff]  ;;  %p296_p0 = scmp.ne.s32.totalorder %s194_s29, %s295_s30  ;;  %p301_p2 = scmp.lt.s32.totalorder %s295_s30, %s295_s30 }
   0xd   :  { %72 = vperm.xlu1 %293, %v21_v0   ;;  %82 = vperm.xlu0 %294, %v21_v0   ;;  %v68_v53 = vrot.slane %v22_v36, %v67_v44  ;;  %v78_v54 = vrot.slane %v22_v36, %v77_v46  ;;  %v88_v57 = vrot.slane %v22_v36, %v87_v48 }
   0xe   :  { %263 = vmatpush3.bf16.msra.mxu0 %v262_v14  ;;  %p302_p3 = por %p301_p2, %p300_p1 }
   0xf   :  { %264 = vmatprep.subr.bf16.mxu0 %v321_v8 }
  0x10   :  { %p303_p4 = pnand %p302_p3, %p296_p0 }
  0x12   :  { %266 = vmatpush3.bf16.msra.mxu0 %v265_v19 }
  0x13   :  { %267 = vmatprep.subr.bf16.mxu0 %v321_v8 }
  0x16   :  { %269 = vmatpush3.bf16.msra.mxu0 %v268_v22 }
  0x17   :  { %270 = vmatprep.subr.bf16.mxu0 %v321_v8 }
  0x1a   :  { %272 = vmatpush3.bf16.msra.mxu0 %v271_v26 }
  0x1b   :  { %273 = vmatprep.subr.bf16.mxu0 %v321_v8 }
  0x1e   :  { %275 = vmatpush3.bf16.msra.mxu0 %v274_v29 }
  0x1f   :  { %276 = vmatprep.subr.bf16.mxu0 %v321_v8 }
  0x22   :  { %278 = vmatpush3.bf16.msra.mxu0 %v277_v32 }
  0x81   :  { %v27_v39 = vpop.permute.xlu0 %26  ;;  %v53_v41 = vpop.permute.xlu1 %52 }
  0x82   :  { %v33_v42 = vmul.f32 %v32_v37, %v27_v39  ;;  %v59_v55 = vmul.f32 %v58_v47, %v53_v41 }
  0x84   :  { %v40_v51 = vadd.f32 %v201_v45, %v33_v42 }
  0x87   :  { %v43_v49 = vpop.permute.xlu0 %42  ;;  %v63_v50 = vpop.permute.xlu1 %62 }
  0x88   :  { %v49_v52 = vmul.f32 %v48_v43, %v43_v49  ;;  %v69_v59 = vmul.f32 %v68_v53, %v63_v50 }
  0x8a   :  { %v50_v56 = vadd.f32 %v49_v52, %v40_v51 }
  0x8c   :  { %v60_v58 = vadd.f32 %v59_v55, %v50_v56  ;;  %v73_v60 = vpop.permute.xlu1 %72  ;;  %v83_v61 = vpop.permute.xlu0 %82 }
  0x8d   :  { %v79_v62 = vmul.f32 %v78_v54, %v73_v60  ;;  %v89_v0 = vmul.f32 %v88_v57, %v83_v61 }
  0x8e   :  { %v70_v63 = vadd.f32 %v69_v59, %v60_v58 }
  0x90   :  { %v80_v1 = vadd.f32 %v79_v62, %v70_v63 }
  0x92   :  { %v90_v2 = vadd.f32 %v89_v0, %v80_v1 }
  0x94   :  { %v91_v3 = vmax.f32 %v90_v2, 0.0 }
  0x96   :  { %253 = vmatmul.mubr.f32.vlgmr.msra.gmra.mrb[0].mxu0 %v91_v3 }
 0x169   :  { %v181_v5 = vpop.f32.mrb[0].mxu0 }
 0x16a   :  { %v182_v6 = vadd.f32 %v202_v4, %v181_v5  ;;  %v254_v7 = vpop.f32.mrb[1].mxu0 }
 0x16c   :  { %186 = vst.msk [vmem:[#allocation2] sm:$0xff] %vm185_vm1, %v182_v6 }
 0x16d   :  { %306 = shalt.err (!%p303_p4)
}
 0x16e   :  { %s307_s8 = scalar_lea.hbm %s436_s5, 128 }
 0x16f   :  { %p308_p5 = scmp.ne.s32.totalorder %s436_s5, %s307_s8  ;;  %p311_p6 = scmp.lt.u32.totalorder %s307_s8, %s436_s5 }
 0x171   :  { %p313_p7 = pnand %p311_p6, %p308_p5 }
 0x173   :  { %316 = shalt.err (!%p313_p7)
}
 0x174   :  { %196 = dma.vmem_to_hbm [thread:$0]  %s194_s29, 128, %s436_s5, [#allocation3]  }
 0x175   :  { %317 = dma.done.wait [#allocation3], 128  }
 0x176   :  { %318 = vsyncadd [#allocation3], 4294967168 }
 0x177   :  { %200 = vsyncpa [#allocation3], 1 }

</bundles_post_ra>
